<compile_context>
chip_gen: v6e
topology: v6e:2x2x1
jax: 0.10.0
libtpu: 0.0.40
codegen_flags: <defaults>
</compile_context>

<pallas_src>
import numpy as np
import jax
import jax.numpy as jnp
from jax import lax
from jax.experimental import pallas as pl
from jax.experimental.pallas import tpu as pltpu

# ----------------------- synthetic (small) model config ---------------------
BATCH = 2
CHANNELS = 3
SIDE = 24                 # input image H = W
MODEL_INPUT = 16          # stands in for CLIP's 224 input resolution
EMBED_DIM = 32            # stands in for CLIP's 512-d embedding
N_CUTS = 4                # module default is 16; kept small for the demo
N_TARGETS = 3             # number of prompt (target) embeddings

CLIP_MEAN = np.array([0.48145466, 0.4578275, 0.40821073], np.float32)
CLIP_STD = np.array([0.26862954, 0.26130258, 0.27577711], np.float32)


# --------------------------- in-kernel arcsin --------------------------------
def _arcsin_0_1(x):
    # Abramowitz & Stegun 4.4.46 on [0, 1]: |err| <= 2e-8 — far below the bf16
    # operand noise.  Pure VPU polynomial + one sqrt; avoids relying on Mosaic
    # asin lowering.
    p = -0.0012624911
    p = p * x + 0.0066700901
    p = p * x - 0.0170881256
    p = p * x + 0.0308918810
    p = p * x - 0.0501743046
    p = p * x + 0.0889789874
    p = p * x - 0.2145988016
    p = p * x + 1.5707963050
    return 1.5707963267948966 - jnp.sqrt(jnp.maximum(1.0 - x, 0.0)) * p


# ---------------- fused Pallas kernel: encode → dists → loss ----------------
def clip_fused_kernel(x_ref, w_ref, b_ref, t_ref, o_ref):
    """x:(N,K) bf16, w:(K,D) bf16, b:(1,D) f32, t:(D,M) f32 unit columns.
    o:(1,1) f32 in SMEM = mean(2 * arcsin(||a - b|| / 2)^2)."""
    n = x_ref.shape[0]
    m = t_ref.shape[1]

    # encode_image with transforms.Normalize pre-folded into (w', bias):
    #   ((x - mean) * istd) @ W  ==  x @ (istd[:,None]*W) - (mean*istd)@W
    emb = jnp.dot(x_ref[...], w_ref[...],
                  preferred_element_type=jnp.float32) - b_ref[...]     # (N,D)

    # F.normalize factored out of the pairwise dot: scale the (N,M) result by
    # rsqrt(max(||emb||^2, 1e-24)) == 1 / max(||emb||, 1e-12)  (EUP rsqrt).
    inv = lax.rsqrt(jnp.maximum(
        jnp.sum(emb * emb, axis=-1, keepdims=True), 1e-24))            # (N,1)

    # pairwise chordal distance on the MXU (targets pre-unit-normalized):
    #   ||a - b||^2 = 2 - 2 a.b   for unit vectors
    g = jnp.dot(emb, t_ref[...], preferred_element_type=jnp.float32) * inv
    d = jnp.sqrt(jnp.maximum(2.0 - 2.0 * g, 0.0))                      # (N,M)

    # .div(2).arcsin().pow(2).mul(2).mean() — fused epilogue, scalar output.
    h = jnp.clip(d * 0.5, 0.0, 1.0)                 # guard arcsin domain
    a = _arcsin_0_1(h)
    o_ref[0, 0] = jnp.sum(2.0 * a * a) * (1.0 / (n * m))


def clip_loss_fused(x_flat_bf16, w_folded_bf16, bias_f32, t_dn_f32):
    # Everything fits in VMEM at this size (x 12 KB, W' 48 KB bf16), so a
    # single grid-less invocation with full-array VMEM blocks is optimal; the
    # (N,D) embedding and the (N,M) distances never touch HBM and the loss
    # comes back as a lane-dense-free (1,1) SMEM scalar.
    vmem = lambda: pl.BlockSpec(memory_space=pltpu.MemorySpace.VMEM)
    loss = pl.pallas_call(
        clip_fused_kernel,
        out_shape=jax.ShapeDtypeStruct((1, 1), jnp.float32),
        in_specs=[vmem(), vmem(), vmem(), vmem()],
        out_specs=pl.BlockSpec(memory_space=pltpu.MemorySpace.SMEM),
    )(x_flat_bf16, w_folded_bf16, bias_f32, t_dn_f32)
    return loss[0, 0]


# --------------------------- host-side glue ---------------------------------
def adaptive_avg_pool2d(x, out_size):
    # matches torch.nn.functional.adaptive_avg_pool2d bin boundaries
    _, _, h, w = x.shape

    def pool_axis(arr, in_len, axis):
        pieces = []
        for i in range(out_size):
            start = (i * in_len) // out_size
            end = -((-(i + 1) * in_len) // out_size)   # ceil((i+1)*in_len/out)
            idx = [slice(None)] * arr.ndim
            idx[axis] = slice(start, end)
            pieces.append(arr[tuple(idx)].mean(axis=axis, keepdims=True))
        return jnp.concatenate(pieces, axis=axis)

    x = pool_axis(x, h, 2)
    x = pool_axis(x, w, 3)
    return x


def make_cutouts(x, n_cuts, model_input, seed=0):
    # deterministic stand-in for torch.rand / torch.randint cutout sampling
    rng = np.random.RandomState(seed)
    side_y, side_x = x.shape[2], x.shape[3]
    max_size = min(side_x, side_y)
    min_size = min(side_x, side_y, model_input)
    cuts = []
    for _ in range(n_cuts):
        size = int(rng.rand() * (max_size - min_size) + min_size)
        offsetx = int(rng.randint(0, side_x - size + 1))
        offsety = int(rng.randint(0, side_y - size + 1))
        cutout = x[:, :, offsety:offsety + size, offsetx:offsetx + size]
        cuts.append(adaptive_avg_pool2d(cutout, model_input))
    return jnp.concatenate(cuts, axis=0)               # torch.cat along batch


def prepare_clip_params(proj_w, target_embeds,
                        channels=CHANNELS, side=MODEL_INPUT):
    """Host-side constant prep.  Call ONCE per model and reuse across
    clip_loss calls — the fold is a full elementwise pass over W, so at real
    scale recomputing it per loss evaluation wastes an entire W read+write of
    HBM bandwidth."""
    c, s = channels, side
    # (x - mean)*istd @ W  ==  x @ (istd[:,None]*W) - (mean*istd) @ W
    mean_k = np.repeat(CLIP_MEAN[:c], s * s).astype(np.float32)         # (K,)
    istd_k = np.repeat(1.0 / CLIP_STD[:c], s * s).astype(np.float32)    # (K,)
    w32 = proj_w.astype(jnp.float32)
    w_folded = jnp.asarray(istd_k)[:, None] * w32                       # (K,D)
    bias = jnp.asarray(mean_k * istd_k)[None, :] @ w32                  # (1,D)
    # Constant targets: F.normalize (eps=1e-12) + transpose once on the host
    # so the kernel does a plain (N,D)@(D,M) dot.
    t = target_embeds.astype(jnp.float32)
    t_n = t / jnp.maximum(jnp.linalg.norm(t, axis=-1, keepdims=True), 1e-12)
    t_dn = t_n.T                                                         # (D,M)
    # bf16 MXU operands for the big W stream; the fold, bias and the tiny
    # targets stay f32 for accuracy (f32 accumulation in-kernel).
    return w_folded.astype(jnp.bfloat16), bias, t_dn


def clip_loss(x, clip_params, n_cuts=N_CUTS):
    if n_cuts > 1:
        x = make_cutouts(x, n_cuts, MODEL_INPUT)       # (n_cuts*B, C, S, S)
    n, c, s, _ = x.shape
    x_flat = x.reshape(n, c * s * s).astype(jnp.bfloat16)
    w_bf16, bias, t_dn = clip_params
    return clip_loss_fused(x_flat, w_bf16, bias, t_dn)


def clip_loss_reference(x, proj_w, target_embeds, n_cuts=N_CUTS):
    # independent pure-JAX f32 reference in the original (subtract-and-norm)
    # form of the PyTorch module
    if n_cuts > 1:
        x = make_cutouts(x, n_cuts, MODEL_INPUT)
    n, c, s, _ = x.shape
    x_flat = x.reshape(n, c * s * s).astype(jnp.float32)
    mean_vec = jnp.repeat(jnp.asarray(CLIP_MEAN[:c]), s * s)[None, :]
    istd_vec = jnp.repeat(1.0 / jnp.asarray(CLIP_STD[:c]), s * s)[None, :]
    emb = ((x_flat - mean_vec) * istd_vec) @ proj_w
    a = emb / jnp.maximum(jnp.linalg.norm(emb, axis=-1, keepdims=True), 1e-12)
    b = target_embeds / jnp.maximum(
        jnp.linalg.norm(target_embeds, axis=-1, keepdims=True), 1e-12)
    d = jnp.linalg.norm(a[:, None, :] - b[None, :, :], axis=-1)
    d = jnp.clip(d * 0.5, 0.0, 1.0)
    return jnp.mean(2.0 * jnp.arcsin(d) ** 2)


if __name__ == "__main__":
    key = jax.random.PRNGKey(0)
    k_img, k_w, k_tgt = jax.random.split(key, 3)

    # TODO(synk): the open_clip ViT-B/32 image/text encoders are not
    # re-implemented; encode_image is a deterministic linear projection and
    # the target prompt embeddings are synthetic deterministic tensors.
    x = jax.random.uniform(k_img, (BATCH, CHANNELS, SIDE, SIDE),
                           dtype=jnp.float32)
    proj_w = jax.random.normal(
        k_w, (CHANNELS * MODEL_INPUT * MODEL_INPUT, EMBED_DIM),
        dtype=jnp.float32) * 0.02
    target_embeds = jax.random.normal(k_tgt, (N_TARGETS, EMBED_DIM),
                                      dtype=jnp.float32)

    clip_params = prepare_clip_params(proj_w, target_embeds)   # once per model
    loss = clip_loss(x, clip_params)
    loss = jax.block_until_ready(loss)

    ref = clip_loss_reference(x, proj_w, target_embeds)
    # bf16 matmul operands (with f32 fold/bias/accumulation) give ~1e-3-level
    # deviation from the all-f32 reference; the in-kernel asin polynomial adds
    # <= 2e-8.  5e-3 leaves comfortable margin.
    assert np.allclose(np.asarray(loss), np.asarray(ref),
                       rtol=5e-3, atol=5e-3), (loss, ref)
    print("KERNEL_OK")
</pallas_src>

<mosaic_0001>
module attributes {stable_mosaic.version = 11 : i64} {
  func.func @clip_fused_kernel(%arg0: memref<8x768xbf16, #tpu.memory_space<vmem>>, %arg1: memref<768x32xbf16, #tpu.memory_space<vmem>>, %arg2: memref<1x32xf32, #tpu.memory_space<vmem>>, %arg3: memref<32x3xf32, #tpu.memory_space<vmem>>, %arg4: memref<1x1xf32, #tpu.memory_space<smem>>) attributes {dimension_semantics = [], scalar_prefetch = 0 : i64, scratch_operands = 0 : i64, tpu.core_type = #tpu.core_type<tc>} {
    %c0 = arith.constant 0 : index
    %c0_0 = arith.constant 0 : index
    %0 = vector.load %arg0[%c0, %c0_0] : memref<8x768xbf16, #tpu.memory_space<vmem>>, vector<8x768xbf16>
    %c0_1 = arith.constant 0 : index
    %c0_2 = arith.constant 0 : index
    %1 = vector.load %arg1[%c0_1, %c0_2] : memref<768x32xbf16, #tpu.memory_space<vmem>>, vector<768x32xbf16>
    %cst = arith.constant dense<0.000000e+00> : vector<8x32xf32>
    %2 = tpu.matmul %0, %1, %cst {dimension_numbers = #tpu.dot_dimension_numbers<[1], [0], [0], [1], [0, 0, 1, 1], [], []>} : vector<8x768xbf16>, vector<768x32xbf16>, vector<8x32xf32> -> vector<8x32xf32>
    %c0_3 = arith.constant 0 : index
    %c0_4 = arith.constant 0 : index
    %3 = vector.load %arg2[%c0_3, %c0_4] : memref<1x32xf32, #tpu.memory_space<vmem>>, vector<1x32xf32>
    %4 = vector.broadcast %3 : vector<1x32xf32> to vector<8x32xf32>
    %5 = arith.subf %2, %4 : vector<8x32xf32>
    %6 = arith.mulf %5, %5 : vector<8x32xf32>
    %cst_5 = arith.constant dense<0.000000e+00> : vector<8xf32>
    %7 = vector.multi_reduction <add>, %6, %cst_5 [1] : vector<8x32xf32> to vector<8xf32>
    %8 = vector.shape_cast %7 : vector<8xf32> to vector<8x1xf32>
    %cst_6 = arith.constant 1.000000e-24 : f32
    %9 = vector.broadcast %cst_6 : f32 to vector<8x1xf32>
    %10 = arith.maximumf %8, %9 : vector<8x1xf32>
    %11 = math.rsqrt %10 : vector<8x1xf32>
    %c0_7 = arith.constant 0 : index
    %c0_8 = arith.constant 0 : index
    %12 = vector.load %arg3[%c0_7, %c0_8] : memref<32x3xf32, #tpu.memory_space<vmem>>, vector<32x3xf32>
    %cst_9 = arith.constant dense<0.000000e+00> : vector<8x3xf32>
    %13 = tpu.matmul %5, %12, %cst_9 {dimension_numbers = #tpu.dot_dimension_numbers<[1], [0], [0], [1], [0, 0, 1, 1], [], []>} : vector<8x32xf32>, vector<32x3xf32>, vector<8x3xf32> -> vector<8x3xf32>
    %14 = vector.broadcast %11 : vector<8x1xf32> to vector<8x3xf32>
    %15 = arith.mulf %13, %14 : vector<8x3xf32>
    %cst_10 = arith.constant 2.000000e+00 : f32
    %16 = vector.broadcast %cst_10 : f32 to vector<8x3xf32>
    %17 = arith.mulf %16, %15 : vector<8x3xf32>
    %cst_11 = arith.constant 2.000000e+00 : f32
    %18 = vector.broadcast %cst_11 : f32 to vector<8x3xf32>
    %19 = arith.subf %18, %17 : vector<8x3xf32>
    %cst_12 = arith.constant 0.000000e+00 : f32
    %20 = vector.broadcast %cst_12 : f32 to vector<8x3xf32>
    %21 = arith.maximumf %19, %20 : vector<8x3xf32>
    %22 = math.sqrt %21 : vector<8x3xf32>
    %cst_13 = arith.constant 5.000000e-01 : f32
    %23 = vector.broadcast %cst_13 : f32 to vector<8x3xf32>
    %24 = arith.mulf %22, %23 : vector<8x3xf32>
    %cst_14 = arith.constant 0.000000e+00 : f32
    %cst_15 = arith.constant 1.000000e+00 : f32
    %25 = vector.broadcast %cst_14 : f32 to vector<8x3xf32>
    %26 = arith.maximumf %25, %24 : vector<8x3xf32>
    %27 = vector.broadcast %cst_15 : f32 to vector<8x3xf32>
    %28 = arith.minimumf %27, %26 : vector<8x3xf32>
    %cst_16 = arith.constant -0.0012624911 : f32
    %29 = vector.broadcast %cst_16 : f32 to vector<8x3xf32>
    %30 = arith.mulf %29, %28 : vector<8x3xf32>
    %cst_17 = arith.constant 6.670090e-03 : f32
    %31 = vector.broadcast %cst_17 : f32 to vector<8x3xf32>
    %32 = arith.addf %30, %31 : vector<8x3xf32>
    %33 = arith.mulf %32, %28 : vector<8x3xf32>
    %cst_18 = arith.constant 0.0170881264 : f32
    %34 = vector.broadcast %cst_18 : f32 to vector<8x3xf32>
    %35 = arith.subf %33, %34 : vector<8x3xf32>
    %36 = arith.mulf %35, %28 : vector<8x3xf32>
    %cst_19 = arith.constant 0.0308918804 : f32
    %37 = vector.broadcast %cst_19 : f32 to vector<8x3xf32>
    %38 = arith.addf %36, %37 : vector<8x3xf32>
    %39 = arith.mulf %38, %28 : vector<8x3xf32>
    %cst_20 = arith.constant 0.0501743034 : f32
    %40 = vector.broadcast %cst_20 : f32 to vector<8x3xf32>
    %41 = arith.subf %39, %40 : vector<8x3xf32>
    %42 = arith.mulf %41, %28 : vector<8x3xf32>
    %cst_21 = arith.constant 0.0889789909 : f32
    %43 = vector.broadcast %cst_21 : f32 to vector<8x3xf32>
    %44 = arith.addf %42, %43 : vector<8x3xf32>
    %45 = arith.mulf %44, %28 : vector<8x3xf32>
    %cst_22 = arith.constant 0.214598805 : f32
    %46 = vector.broadcast %cst_22 : f32 to vector<8x3xf32>
    %47 = arith.subf %45, %46 : vector<8x3xf32>
    %48 = arith.mulf %47, %28 : vector<8x3xf32>
    %cst_23 = arith.constant 1.57079625 : f32
    %49 = vector.broadcast %cst_23 : f32 to vector<8x3xf32>
    %50 = arith.addf %48, %49 : vector<8x3xf32>
    %cst_24 = arith.constant 1.000000e+00 : f32
    %51 = vector.broadcast %cst_24 : f32 to vector<8x3xf32>
    %52 = arith.subf %51, %28 : vector<8x3xf32>
    %cst_25 = arith.constant 0.000000e+00 : f32
    %53 = vector.broadcast %cst_25 : f32 to vector<8x3xf32>
    %54 = arith.maximumf %52, %53 : vector<8x3xf32>
    %55 = math.sqrt %54 : vector<8x3xf32>
    %56 = arith.mulf %55, %50 : vector<8x3xf32>
    %cst_26 = arith.constant 1.57079637 : f32
    %57 = vector.broadcast %cst_26 : f32 to vector<8x3xf32>
    %58 = arith.subf %57, %56 : vector<8x3xf32>
    %cst_27 = arith.constant 2.000000e+00 : f32
    %59 = vector.broadcast %cst_27 : f32 to vector<8x3xf32>
    %60 = arith.mulf %59, %58 : vector<8x3xf32>
    %61 = arith.mulf %60, %58 : vector<8x3xf32>
    %62 = vector.shape_cast %61 : vector<8x3xf32> to vector<1x8x3xf32>
    %cst_28 = arith.constant dense<0.000000e+00> : vector<1xf32>
    %63 = vector.multi_reduction <add>, %62, %cst_28 [1, 2] : vector<1x8x3xf32> to vector<1xf32>
    %64 = vector.shape_cast %63 : vector<1xf32> to vector<1x1x1xf32>
    %65 = vector.extract %64[0, 0, 0] : f32 from vector<1x1x1xf32>
    %cst_29 = arith.constant 0.0416666679 : f32
    %66 = arith.mulf %65, %cst_29 : f32
    %c0_30 = arith.constant 0 : index
    %c0_31 = arith.constant 0 : index
    %67 = memref.load %arg4[%c0_30, %c0_31] : memref<1x1xf32, #tpu.memory_space<smem>>
    memref.store %66, %arg4[%c0_30, %c0_31] : memref<1x1xf32, #tpu.memory_space<smem>>
    return
  }
}

</mosaic_0001>

<bundles_post_ra>
// kernel: tpu_custom_call.1
= control target key start
LH: loop header
LB: loop body
LE: loop exit
PB: predicated region body
PF: predicated region fallthrough
CT: control target
= control target key end

     0   :  { %s1122_s0 = inlined_call_operand.vmem [shape: bf16[8,768], index: 0, kind: input, shape index: {}]   ;;  %s1123_s1 = inlined_call_operand.vmem [shape: bf16[768,32], index: 1, kind: input, shape index: {}]   ;;  %s1124_s2 = inlined_call_operand.vmem [shape: f32[1,32], index: 2, kind: input, shape index: {}]   ;;  %s1125_s3 = inlined_call_operand.vmem [shape: f32[32,3], index: 3, kind: input, shape index: {}]   ;;  %s1126_s4 = inlined_call_operand.hbm [shape: f32[1,1], index: 4, kind: output, shape index: {}]  }
   0x1   :  { %v853_v0 = vld [vmem:[%s1123_s1 + $0x78] sm:$0xff]   ;;  %v857_v4 = vld [vmem:[%s1123_s1 + $0x70] sm:$0xff]   ;;  %v861_v8 = vld [vmem:[%s1123_s1 + $0x68] sm:$0xff]  }
   0x2   :  { %v854_v1 = vld [vmem:[%s1123_s1 + $0xf8] sm:$0xff]   ;;  %766 = vmatprep.subr.bf16.mxu0 %v853_v0  ;;  %v858_v5 = vld [vmem:[%s1123_s1 + $0xf0] sm:$0xff]   ;;  %v862_v9 = vld [vmem:[%s1123_s1 + $0xe8] sm:$0xff]  }
   0x3   :  { %v855_v2 = vld [vmem:[%s1123_s1 + $0x38] sm:$0xff]   ;;  %788 = vmatprep.subr.bf16.mxu1 %v854_v1  ;;  %v859_v6 = vld [vmem:[%s1123_s1 + $0x30] sm:$0xff]   ;;  %v863_v10 = vld [vmem:[%s1123_s1 + $0x28] sm:$0xff]  }
   0x4   :  { %v856_v3 = vld [vmem:[%s1123_s1 + $0xb8] sm:$0xff]   ;;  %767 = vmatpush3.bf16.msra.mxu0 %v855_v2  ;;  %v860_v7 = vld [vmem:[%s1123_s1 + $0xb0] sm:$0xff]   ;;  %v864_v11 = vld [vmem:[%s1123_s1 + $0xa8] sm:$0xff]  }
   0x5   :  { %789 = vmatpush3.bf16.msra.mxu1 %v856_v3  ;;  %768 = vmatprep.subr.bf16.mxu0 %v857_v4  ;;  %v865_v12 = vld [vmem:[%s1123_s1 + $0x60] sm:$0xff]   ;;  %v869_v16 = vld [vmem:[%s1123_s1 + $0x58] sm:$0xff]   ;;  %v873_v20 = vld [vmem:[%s1123_s1 + $0x50] sm:$0xff]  }
   0x6   :  { %790 = vmatprep.subr.bf16.mxu1 %v858_v5  ;;  %v866_v13 = vld [vmem:[%s1123_s1 + $0xe0] sm:$0xff]   ;;  %v870_v17 = vld [vmem:[%s1123_s1 + $0xd8] sm:$0xff]   ;;  %v874_v21 = vld [vmem:[%s1123_s1 + $0xd0] sm:$0xff]  }
   0x7   :  { %v867_v14 = vld [vmem:[%s1123_s1 + $0x20] sm:$0xff]   ;;  %v871_v18 = vld [vmem:[%s1123_s1 + $0x18] sm:$0xff]   ;;  %v875_v22 = vld [vmem:[%s1123_s1 + $0x10] sm:$0xff]  }
   0x8   :  { %769 = vmatpush3.bf16.msra.mxu0 %v859_v6  ;;  %v868_v15 = vld [vmem:[%s1123_s1 + $0xa0] sm:$0xff]   ;;  %v872_v19 = vld [vmem:[%s1123_s1 + $0x98] sm:$0xff]   ;;  %v876_v23 = vld [vmem:[%s1123_s1 + $0x90] sm:$0xff]  }
   0x9   :  { %791 = vmatpush3.bf16.msra.mxu1 %v860_v7  ;;  %770 = vmatprep.subr.bf16.mxu0 %v861_v8  ;;  %v877_v24 = vld [vmem:[%s1123_s1 + $0x48] sm:$0xff]   ;;  %v881_v28 = vld [vmem:[%s1123_s1 + $0x40] sm:$0xff]   ;;  %v889_v38 = vld [vmem:[%s1123_s1 + $0x178] sm:$0xff]  }
   0xa   :  { %792 = vmatprep.subr.bf16.mxu1 %v862_v9  ;;  %v878_v25 = vld [vmem:[%s1123_s1 + $0xc8] sm:$0xff]   ;;  %v882_v29 = vld [vmem:[%s1123_s1 + $0xc0] sm:$0xff]   ;;  %v890_v39 = vld [vmem:[%s1123_s1 + $0x138] sm:$0xff]  }
   0xb   :  { %v879_v26 = vld [vmem:[%s1123_s1 + $0x8] sm:$0xff]   ;;  %v883_v30 = vld [vmem:[%s1123_s1] sm:$0xff]   ;;  %v891_v40 = vld [vmem:[%s1123_s1 + $0x170] sm:$0xff]  }
   0xc   :  { %771 = vmatpush3.bf16.msra.mxu0 %v863_v10  ;;  %v880_v27 = vld [vmem:[%s1123_s1 + $0x88] sm:$0xff]   ;;  %v884_v31 = vld [vmem:[%s1123_s1 + $0x80] sm:$0xff]   ;;  %v892_v41 = vld [vmem:[%s1123_s1 + $0x130] sm:$0xff]  }
   0xd   :  { %793 = vmatpush3.bf16.msra.mxu1 %v864_v11  ;;  %772 = vmatprep.subr.bf16.mxu0 %v865_v12  ;;  %v19_v32 = vld [vmem:[%s1122_s0] sm:$0xff]  ;;  %v20_v33 = vld [vmem:[%s1122_s0 + $0x8] sm:$0xff]  ;;  %v897_v46 = vld [vmem:[%s1123_s1 + $0x158] sm:$0xff]  }
   0xe   :  { %794 = vmatprep.subr.bf16.mxu1 %v866_v13  ;;  %v707_v34 = vcombine.low %v19_v32, %v19_v32  ;;  %v708_v35 = vcombine.high %v19_v32, %v19_v32  ;;  %v709_v36 = vcombine.low %v20_v33, %v20_v33  ;;  %v710_v37 = vcombine.high %v20_v33, %v20_v33  ;;  %v893_v42 = vld [vmem:[%s1123_s1 + $0x168] sm:$0xff]   ;;  %v895_v44 = vld [vmem:[%s1123_s1 + $0x160] sm:$0xff]   ;;  %v21_v47 = vld [vmem:[%s1122_s0 + $0x10] sm:$0xff] }
   0xf   :  { %v894_v43 = vld [vmem:[%s1123_s1 + $0x128] sm:$0xff]   ;;  %v896_v45 = vld [vmem:[%s1123_s1 + $0x120] sm:$0xff]   ;;  %v712_v48 = vcombine.high %v21_v47, %v21_v47 }
  0x10   :  { %773 = vmatpush3.bf16.msra.mxu0 %v867_v14  ;;  %459 = vmatprep.mubr.bf16.mxu0 %v708_v35 }
  0x11   :  { %795 = vmatpush3.bf16.msra.mxu1 %v868_v15  ;;  %774 = vmatprep.subr.bf16.mxu0 %v869_v16 }
  0x12   :  { %796 = vmatprep.subr.bf16.mxu1 %v870_v17  ;;  %499 = vmatprep.mubr.bf16.mxu1 %v710_v37 }
  0x14   :  { %775 = vmatpush3.bf16.msra.mxu0 %v871_v18 }
  0x15   :  { %797 = vmatpush3.bf16.msra.mxu1 %v872_v19  ;;  %776 = vmatprep.subr.bf16.mxu0 %v873_v20 }
  0x16   :  { %798 = vmatprep.subr.bf16.mxu1 %v874_v21 }
  0x18   :  { %777 = vmatpush3.bf16.msra.mxu0 %v875_v22 }
  0x19   :  { %799 = vmatpush3.bf16.msra.mxu1 %v876_v23  ;;  %778 = vmatprep.subr.bf16.mxu0 %v877_v24 }
  0x1a   :  { %800 = vmatprep.subr.bf16.mxu1 %v878_v25 }
  0x1c   :  { %779 = vmatpush3.bf16.msra.mxu0 %v879_v26 }
  0x1d   :  { %801 = vmatpush3.bf16.msra.mxu1 %v880_v27  ;;  %780 = vmatprep.subr.bf16.mxu0 %v881_v28 }
  0x1e   :  { %802 = vmatprep.subr.bf16.mxu1 %v882_v29 }
  0x20   :  { %781 = vmatpush3.bf16.msra.mxu0 %v883_v30 }
  0x21   :  { %803 = vmatpush3.bf16.msra.mxu1 %v884_v31  ;;  %810 = vmatprep.subr.bf16.mxu0 %v889_v38 }
  0x23   :  { %460 = vmatmul.mubr.bf16.vlgmr.msra.gmra.mxu0 %v707_v34 }
  0x24   :  { %500 = vmatmul.mubr.bf16.vlgmr.msra.gmra.mxu1 %v709_v36  ;;  %811 = vmatpush3.bf16.msra.mxu0 %v890_v39 }
  0x25   :  { %812 = vmatprep.subr.bf16.mxu0 %v891_v40 }
  0x28   :  { %813 = vmatpush3.bf16.msra.mxu0 %v892_v41 }
  0x29   :  { %814 = vmatprep.subr.bf16.mxu0 %v893_v42 }
  0x2c   :  { %815 = vmatpush3.bf16.msra.mxu0 %v894_v43 }
  0x2d   :  { %816 = vmatprep.subr.bf16.mxu0 %v895_v44 }
  0x2e   :  { %9 = vsyncpa [#allocation3], 0  ;;  %v898_v49 = vld [vmem:[%s1123_s1 + $0x118] sm:$0xff]   ;;  %v899_v50 = vld [vmem:[%s1123_s1 + $0x150] sm:$0xff]   ;;  %539 = vmatprep.mubr.bf16.mxu0 %v712_v48  ;;  %v711_v56 = vcombine.low %v21_v47, %v21_v47  ;;  %v923_v58 = vmov 0.0   ;;  %vm924_vm0 = vmmov 0  }
  0x2f   :  { %v900_v51 = vld [vmem:[%s1123_s1 + $0x110] sm:$0xff]   ;;  %v901_v52 = vld [vmem:[%s1123_s1 + $0x148] sm:$0xff]   ;;  %v903_v54 = vld [vmem:[%s1123_s1 + $0x140] sm:$0xff]   ;;  %837 = vmatprep.subr.mxu1 %v923_v58  ;;  %845 = vmatprep.mubr.msk.f32.mxu1 %vm924_vm0, %v923_v58  ;;  %vm556_vm1 = vcmask 261120   ;;  %vm680_vm6 = vcmask 23552   ;;  %s925_s21 = smov [#allocation2]  }
  0x30   :  { %817 = vmatpush3.bf16.msra.mxu0 %v896_v45  ;;  %v902_v53 = vld [vmem:[%s1123_s1 + $0x108] sm:$0xff]   ;;  %v904_v55 = vld [vmem:[%s1123_s1 + $0x100] sm:$0xff]   ;;  %v565_v57 = vld [vmem:[%s1125_s3 + $0x18] sm:$0xff] }
  0x31   :  { %818 = vmatprep.subr.bf16.mxu0 %v897_v46  ;;  %838 = vmatpush3.msra.mxu1 %v565_v57  ;;  %v564_v59 = vld [vmem:[%s1125_s3 + $0x10] sm:$0xff]  ;;  %v563_v60 = vld [vmem:[%s1125_s3 + $0x8] sm:$0xff]  ;;  %v562_v61 = vld [vmem:[%s1125_s3] sm:$0xff] }
  0x32   :  { %839 = vmatprep.subr.mxu1 %v923_v58  ;;  %v761_v12 = vld [vmem:[%s1124_s2] ss:$0 sm:$0xff] }
  0x33   :  { %840 = vmatpush3.msra.mxu1 %v564_v59 }
  0x34   :  { %819 = vmatpush3.bf16.msra.mxu0 %v898_v49  ;;  %841 = vmatprep.subr.mxu1 %v923_v58 }
  0x35   :  { %820 = vmatprep.subr.bf16.mxu0 %v899_v50  ;;  %842 = vmatpush3.msra.mxu1 %v563_v60 }
  0x36   :  { %843 = vmatprep.subr.mxu1 %v923_v58 }
  0x37   :  { %844 = vmatpush3.msra.mxu1 %v562_v61 }
  0x38   :  { %821 = vmatpush3.bf16.msra.mxu0 %v900_v51 }
  0x39   :  { %822 = vmatprep.subr.bf16.mxu0 %v901_v52 }
  0x3c   :  { %823 = vmatpush3.bf16.msra.mxu0 %v902_v53 }
  0x3d   :  { %824 = vmatprep.subr.bf16.mxu0 %v903_v54 }
  0x40   :  { %825 = vmatpush3.bf16.msra.mxu0 %v904_v55 }
  0x43   :  { %540 = vmatmul.mubr.bf16.vlgmr.msra.gmra.mxu0 %v711_v56 }
  0xe3   :  { %v782_v62 = vpop.f32.mrf.mxu0 }
  0xe4   :  { %v804_v63 = vpop.f32.mrf.mxu1 }
  0xe5   :  { %v783_v0 = vpop.f32.mrf.mxu0 }
  0xe6   :  { %v805_v1 = vpop.f32.mrf.mxu1  ;;  %v784_v6 = vadd.f32 %v783_v0, %v782_v62 }
  0xe7   :  { %v785_v2 = vpop.f32.mrf.mxu0  ;;  %v806_v7 = vadd.f32 %v805_v1, %v804_v63 }
  0xe8   :  { %v807_v3 = vpop.f32.mrf.mxu1 }
  0xe9   :  { %v786_v4 = vpop.f32.mrf.mxu0  ;;  %v502_v10 = vadd.f32 %v806_v7, %v784_v6 }
  0xea   :  { %v808_v5 = vpop.f32.mrf.mxu1 }
 0x103   :  { %v826_v8 = vpop.f32.mrf.mxu0 }
 0x105   :  { %v827_v9 = vpop.f32.mrf.mxu0 }
 0x106   :  { %v828_v11 = vadd.f32 %v827_v9, %v826_v8 }
 0x107   :  { %v829_v13 = vpop.f32.mrf.mxu0 }
 0x108   :  { %v542_v14 = vadd.f32 %v828_v11, %v502_v10 }
 0x109   :  { %v830_v15 = vpop.f32.mrf.mxu0 }
 0x10a   :  { %v554_v16 = vsub.f32 %v542_v14, %v761_v12 }
 0x10c   :  { %846 = vmatmul.mubr.msk.f32.vlgmr.msra.gmra.mxu1 %vm556_vm1, %v554_v16  ;;  %v555_v17 = vmul.f32 %v554_v16, %v554_v16 }
 0x10e   :  { %v557_v18 = vsel %vm556_vm1, %v555_v17, 0.0 }
 0x10f   :  { %558 = vadd.xlane.f32.xlu0 %v557_v18 }
 0x198   :  { %v559_v19 = vpop.xlane.xlu0 %558 }
 0x199   :  { %v560_v20 = vmax.f32 %v559_v19, 1e-24 }
 0x19b   :  { %907 = vrsqrt.f32 %v560_v20 }
 0x1a8   :  { %v908_v21 = vpop.eup %907 }
 0x1cc   :  { %v635_v22 = vpop.f32.mrf.mxu1 }
 0x1cd   :  { %v639_v23 = vmul.f32 %v908_v21, %v635_v22 }
 0x1ce   :  { %v847_v24 = vpop.f32.mrf.mxu1 }
 0x1cf   :  { %v640_v25 = vmul.f32 2.0, %v639_v23 }
 0x1d1   :  { %v641_v26 = vsub.f32 2.0, %v640_v25 }
 0x1d3   :  { %v642_v27 = vmax.f32 %v641_v26, 0.0 }
 0x1d5   :  { %909 = vrsqrt.f32 %v642_v27  ;;  %vm645_vm2 = vcmp.eq.f32.partialorder %v642_v27, inf  ;;  %v648_v30 = vand.u32 2147483648, %v642_v27  ;;  %vm647_vm3 = vcmp.eq.f32.partialorder %v642_v27, 0.0 }
 0x1e2   :  { %v910_v28 = vpop.eup %909 }
 0x1e3   :  { %v644_v29 = vmul.f32 %v910_v28, %v642_v27 }
 0x1e5   :  { %v646_v31 = vsel %vm645_vm2, %v642_v27, %v644_v29 }
 0x1e6   :  { %v649_v32 = vsel %vm647_vm3, %v648_v30, %v646_v31 }
 0x1e7   :  { %v650_v33 = vmul.f32 0.5, %v649_v32 }
 0x1e9   :  { %v651_v34 = vmax.f32 %v650_v33, 0.0 }
 0x1eb   :  { %v652_v35 = vmin.f32 %v651_v34, 1.0 }
 0x1ed   :  { %v653_v36 = vmul.f32 -0.0012624911, %v652_v35  ;;  %v667_v37 = vsub.f32 1.0, %v652_v35 }
 0x1ef   :  { %v654_v38 = vadd.f32 0.00667009, %v653_v36  ;;  %v668_v39 = vmax.f32 %v667_v37, 0.0 }
 0x1f1   :  { %v655_v40 = vmul.f32 %v654_v38, %v652_v35  ;;  %911 = vrsqrt.f32 %v668_v39  ;;  %vm671_vm4 = vcmp.eq.f32.partialorder %v668_v39, inf  ;;  %v674_v54 = vand.u32 2147483648, %v668_v39 }
 0x1f2   :  { %vm673_vm5 = vcmp.eq.f32.partialorder %v668_v39, 0.0 }
 0x1f3   :  { %v763_v41 = vadd.f32 -0.017088126, %v655_v40 }
 0x1f5   :  { %v657_v42 = vmul.f32 %v763_v41, %v652_v35 }
 0x1f7   :  { %v658_v43 = vadd.f32 0.03089188, %v657_v42 }
 0x1f9   :  { %v659_v44 = vmul.f32 %v658_v43, %v652_v35 }
 0x1fb   :  { %v764_v45 = vadd.f32 -0.050174303, %v659_v44 }
 0x1fd   :  { %v661_v46 = vmul.f32 %v764_v45, %v652_v35 }
 0x1fe   :  { %v912_v47 = vpop.eup %911 }
 0x1ff   :  { %v662_v48 = vadd.f32 0.08897899, %v661_v46  ;;  %v670_v50 = vmul.f32 %v912_v47, %v668_v39 }
 0x201   :  { %v663_v49 = vmul.f32 %v662_v48, %v652_v35  ;;  %v672_v53 = vsel %vm671_vm4, %v668_v39, %v670_v50 }
 0x202   :  { %v675_v56 = vsel %vm673_vm5, %v674_v54, %v672_v53 }
 0x203   :  { %v765_v51 = vadd.f32 -0.2145988, %v663_v49 }
 0x205   :  { %v665_v52 = vmul.f32 %v765_v51, %v652_v35 }
 0x207   :  { %v666_v55 = vadd.f32 1.5707963, %v665_v52 }
 0x209   :  { %v676_v57 = vmul.f32 %v675_v56, %v666_v55 }
 0x20b   :  { %v677_v58 = vsub.f32 1.5707964, %v676_v57 }
 0x20d   :  { %v678_v59 = vmul.f32 2.0, %v677_v58 }
 0x20f   :  { %v679_v60 = vmul.f32 %v678_v59, %v677_v58 }
 0x211   :  { %v681_v61 = vsel %vm680_vm6, %v679_v60, 0.0 }
 0x212   :  { %682 = vadd.xlane.f32.xlu0 %v681_v61 }
 0x29b   :  { %v683_v62 = vpop.xlane.xlu0 %682 }
 0x29c   :  { %v684_v63 = vrot.slane %v683_v62, 4 }
 0x29e   :  { %v685_v0 = vadd.f32 %v684_v63, %v683_v62 }
 0x2a0   :  { %v686_v1 = vrot.slane %v685_v0, 2 }
 0x2a2   :  { %v687_v2 = vadd.f32 %v686_v1, %v685_v0 }
 0x2a4   :  { %v688_v3 = vrot.slane %v687_v2, 1 }
 0x2a6   :  { %v689_v4 = vadd.f32 %v688_v3, %v687_v2 }
 0x2a8   :  { %848 = vpush %v689_v4 }
 0x2d9   :  { %s849_s2 = spop %848 }
 0x2da   :  { %s691_s3 = smul.f32 0.041666668, %s849_s2 }
 0x2dc   :  { %693 = sst [smem:[#allocation2]] %s691_s3 }
 0x2dd   :  { %701 = dma.smem_to_hbm %s925_s21, 16, %s1126_s4, [#allocation3]  }
 0x2de   :  { %921 = dma.done.wait [#allocation3], 16  }
 0x2df   :  { %922 = vsyncadd [#allocation3], 4294967280 }
 0x2e0   :  { %705 = sfence }
 0x2e1   :  { %706 = vsyncpa [#allocation3], 1 }

</bundles_post_ra>
